<compile_context>
chip_gen: v7x
topology: tpu7x:2x2x1
jax: 0.10.0
libtpu: 0.0.40
codegen_flags: <defaults>
</compile_context>

<pallas_src>
import functools

import jax
import jax.numpy as jnp
from jax.experimental import pallas as pl
from jax.experimental.pallas import tpu as pltpu


def se_kernel(x_ref, w1t_ref, w2t_ref, o_ref, *, reduce_axis):
    """One grid step: TB images.

    x_ref/o_ref block: (TB, C, HW) if reduce_axis == 2, else (TB, HW, C).
    w1t_ref: (C, Ch) [= W1.T],  w2t_ref: (Ch, C) [= W2.T].
    """
    # ---- squeeze: global average pool, accumulated in f32 ----
    # TODO(synk): for bf16 inputs on v5e (no bf16 VALU) chunk this reduce so the
    # implicit f32 upcast stays bounded; f32 inputs need no temporary at all.
    y = jnp.mean(x_ref[...], axis=reduce_axis, dtype=jnp.float32)        # (TB, C)

    # ---- excitation: FC -> ReLU -> FC -> sigmoid (weights pre-transposed) ----
    h = jnp.dot(y, w1t_ref[...].astype(jnp.float32),
                preferred_element_type=jnp.float32)                      # (TB, Ch)
    h = jnp.maximum(h, 0.0)
    s = jnp.dot(h, w2t_ref[...].astype(jnp.float32),
                preferred_element_type=jnp.float32)                      # (TB, C)
    s = jax.nn.sigmoid(s)

    # ---- scale: broadcast the per-channel gate over the spatial axis ----
    s_b = s[:, :, None] if reduce_axis == 2 else s[:, None, :]
    if o_ref.dtype == jnp.float32:
        o_ref[...] = x_ref[...] * s_b
    else:
        # Sub-32-bit inputs: multiply in the native dtype so no tile-sized f32
        # temporary is materialized (full-rate bf16 VALU on v6e/v7x).
        o_ref[...] = (x_ref[...] * s_b.astype(o_ref.dtype)).astype(o_ref.dtype)


def _tpu_params():
    """(vmem_capacity_bytes, tensorcores_per_chip) with safe fallbacks."""
    vmem_cap = 64 << 20                       # conservative default: v7x per-TC VMEM
    try:
        vmem_cap = int(pltpu.get_tpu_info().vmem_capacity_bytes)
    except Exception:
        pass
    cores = 1
    try:
        kind = jax.devices()[0].device_kind.lower()
        if any(t in kind for t in ("v7", "v4", "v5p")):   # megacore: 2 TCs per device
            cores = 2
    except Exception:
        pass
    return vmem_cap, cores


def _pick_batch_tile(B, C, HW, itemsize, vmem_cap, num_cores):
    """How many images go in one grid step (TB).  TB always divides B."""
    per_img = max(C * HW * itemsize, 1)
    if vmem_cap >= (100 << 20):               # v5e / v6e: 128 MiB physical VMEM
        target_tile, db_budget = 16 << 20, 56 << 20
    else:                                     # v7x: 64 MiB per TensorCore
        target_tile, db_budget = 8 << 20, 24 << 20

    tb = max(1, min(B, target_tile // per_img))
    while tb > 1 and 4 * tb * per_img > db_budget:    # 2-in + 2-out double buffers
        tb -= 1
    while tb > 1 and B % tb != 0:                     # no ragged last tile
        tb -= 1

    if num_cores >= 2 and B >= 2:
        # Both TensorCores need work, and an even number of grid steps keeps
        # them balanced — but don't shrink the x-tile below ~4 MiB for it.
        min_imgs = max(1, (4 << 20) // per_img)
        cand = tb
        while cand > 1 and (B % cand != 0 or (B // cand) % 2 != 0):
            cand -= 1
        if B % cand == 0 and (B // cand) % 2 == 0 and (cand >= min_imgs or tb < min_imgs):
            tb = cand
    return max(tb, 1)


@jax.jit
def se_layer(x, w1, w2):
    """x: (B, C, H, W) NCHW.  w1: (C//r, C), w2: (C, C//r) — PyTorch (out, in)."""
    B, C, H, W = x.shape
    HW = H * W
    Ch = w1.shape[0]
    itemsize = jnp.dtype(x.dtype).itemsize
    vmem_cap, num_cores = _tpu_params()

    # Lane-dense layout selection (the big masked-store lever).
    channels_last = (HW % 128 != 0) and (C % 128 == 0)
    if channels_last:
        # TODO(synk): callers that already hold NHWC activations could skip this transpose.
        x3 = jnp.transpose(x, (0, 2, 3, 1)).reshape(B, HW, C)    # (B, HW, C)
        block_shape = lambda tb: (tb, HW, C)
        reduce_axis = 1
    else:
        x3 = x.reshape(B, C, HW)                                 # (B, C, HW), free reshape
        block_shape = lambda tb: (tb, C, HW)
        reduce_axis = 2

    # Pre-transpose the tiny weights once so the MXU contracts the RHS on its
    # first (sublane) axis — no per-grid-step relayout.
    w1t = jnp.transpose(w1)    # (C, Ch)
    w2t = jnp.transpose(w2)    # (Ch, C)

    TB = _pick_batch_tile(B, C, HW, itemsize, vmem_cap, num_cores)
    grid = (B // TB,)

    tile_bytes = TB * C * HW * itemsize
    w_bytes = (w1.size + w2.size) * jnp.dtype(w1.dtype).itemsize
    if vmem_cap >= (100 << 20):          # v5e / v6e: plenty of VMEM headroom
        vmem_limit = int(min(96 << 20, max(48 << 20, 4 * tile_bytes + 2 * w_bytes + (8 << 20))))
    else:                                # v7x: stay well under 64 MiB per TC
        vmem_limit = int(min(48 << 20, max(32 << 20, 4 * tile_bytes + 2 * w_bytes + (8 << 20))))

    cost = pl.CostEstimate(
        flops=2 * B * C * HW + 4 * B * C * Ch,       # pool-sum + scale + two tiny FCs
        transcendentals=B * C,                       # sigmoid
        bytes_accessed=2 * B * C * HW * itemsize + w_bytes,
    )

    out3 = pl.pallas_call(
        functools.partial(se_kernel, reduce_axis=reduce_axis),
        out_shape=jax.ShapeDtypeStruct(x3.shape, x.dtype),
        grid_spec=pltpu.PrefetchScalarGridSpec(
            num_scalar_prefetch=0,
            grid=grid,
            in_specs=[
                pl.BlockSpec(block_shape(TB), lambda b: (b, 0, 0)),   # TB images / step
                pl.BlockSpec((C, Ch), lambda b: (0, 0)),              # full W1^T
                pl.BlockSpec((Ch, C), lambda b: (0, 0)),              # full W2^T
            ],
            out_specs=pl.BlockSpec(block_shape(TB), lambda b: (b, 0, 0)),
        ),
        compiler_params=pltpu.CompilerParams(
            dimension_semantics=("parallel",),
            vmem_limit_bytes=vmem_limit,
        ),
        cost_estimate=cost,
    )(x3, w1t, w2t)

    if channels_last:
        return jnp.transpose(out3.reshape(B, H, W, C), (0, 3, 1, 2))
    return out3.reshape(B, C, H, W)


def se_layer_ref(x, w1, w2):
    """Pure-JAX reference matching the PyTorch module."""
    y = jnp.mean(x.astype(jnp.float32), axis=(2, 3))        # (B, C)
    h = jnp.maximum(y @ w1.T.astype(jnp.float32), 0.0)      # (B, C//r)
    s = jax.nn.sigmoid(h @ w2.T.astype(jnp.float32))        # (B, C)
    return (x.astype(jnp.float32) * s[:, :, None, None]).astype(x.dtype)


def _run_case(key, B, C, H, W, reduction):
    Ch = max(C // reduction, 1)
    kx, k1, k2 = jax.random.split(key, 3)
    x = jax.random.normal(kx, (B, C, H, W), dtype=jnp.float32)
    # Deterministic synthetic weights, PyTorch (out_features, in_features) shape.
    w1 = jax.random.normal(k1, (Ch, C), dtype=jnp.float32) / jnp.sqrt(C)
    w2 = jax.random.normal(k2, (C, Ch), dtype=jnp.float32) / jnp.sqrt(Ch)

    out = jax.block_until_ready(se_layer(x, w1, w2))
    ref = se_layer_ref(x, w1, w2)
    assert out.shape == x.shape
    assert jnp.allclose(out, ref, atol=1e-5, rtol=1e-5), "mismatch vs reference"


if __name__ == "__main__":
    key = jax.random.PRNGKey(0)
    ka, kb = jax.random.split(key)
    # Path 1: HW % 128 == 0  ->  (B, C, HW) lane-dense-spatial layout.
    _run_case(ka, B=2, C=64, H=16, W=16, reduction=16)
    # Path 2: HW % 128 != 0, C % 128 == 0  ->  channels-last (B, HW, C) layout.
    _run_case(kb, B=2, C=128, H=8, W=8, reduction=16)
    print("KERNEL_OK")
</pallas_src>

<mosaic_0001>
module attributes {stable_mosaic.version = 11 : i64} {
  func.func @se_kernel(%arg0: i32, %arg1: memref<2x64x256xf32, #tpu.memory_space<vmem>>, %arg2: memref<64x4xf32, #tpu.memory_space<vmem>>, %arg3: memref<4x64xf32, #tpu.memory_space<vmem>>, %arg4: memref<2x64x256xf32, #tpu.memory_space<vmem>>) attributes {dimension_semantics = [#tpu.dimension_semantics<parallel>], iteration_bounds = array<i64: 1>, scalar_prefetch = 0 : i64, scratch_operands = 0 : i64, tpu.core_type = #tpu.core_type<tc>, window_params = [{transform_indices = @transform_0, window_bounds = array<i64: 2, 64, 256>}, {pipeline_mode = #tpu.pipeline_mode<synchronous>, transform_indices = @transform_1, window_bounds = array<i64: 64, 4>}, {pipeline_mode = #tpu.pipeline_mode<synchronous>, transform_indices = @transform_2, window_bounds = array<i64: 4, 64>}, {transform_indices = @transform_3, window_bounds = array<i64: 2, 64, 256>}]} {
    %c0 = arith.constant 0 : index
    %c0_0 = arith.constant 0 : index
    %c0_1 = arith.constant 0 : index
    %0 = vector.load %arg1[%c0, %c0_0, %c0_1] : memref<2x64x256xf32, #tpu.memory_space<vmem>>, vector<2x64x256xf32>
    %cst = arith.constant dense<0.000000e+00> : vector<2x64xf32>
    %1 = vector.multi_reduction <add>, %0, %cst [2] : vector<2x64x256xf32> to vector<2x64xf32>
    %cst_2 = arith.constant 2.560000e+02 : f32
    %2 = vector.broadcast %cst_2 : f32 to vector<2x64xf32>
    %3 = arith.divf %1, %2 : vector<2x64xf32>
    %c0_3 = arith.constant 0 : index
    %c0_4 = arith.constant 0 : index
    %4 = vector.load %arg2[%c0_3, %c0_4] : memref<64x4xf32, #tpu.memory_space<vmem>>, vector<64x4xf32>
    %cst_5 = arith.constant dense<0.000000e+00> : vector<2x4xf32>
    %5 = tpu.matmul %3, %4, %cst_5 {dimension_numbers = #tpu.dot_dimension_numbers<[1], [0], [0], [1], [0, 0, 1, 1], [], []>} : vector<2x64xf32>, vector<64x4xf32>, vector<2x4xf32> -> vector<2x4xf32>
    %cst_6 = arith.constant 0.000000e+00 : f32
    %6 = vector.broadcast %cst_6 : f32 to vector<2x4xf32>
    %7 = arith.maximumf %5, %6 : vector<2x4xf32>
    %c0_7 = arith.constant 0 : index
    %c0_8 = arith.constant 0 : index
    %8 = vector.load %arg3[%c0_7, %c0_8] : memref<4x64xf32, #tpu.memory_space<vmem>>, vector<4x64xf32>
    %cst_9 = arith.constant dense<0.000000e+00> : vector<2x64xf32>
    %9 = tpu.matmul %7, %8, %cst_9 {dimension_numbers = #tpu.dot_dimension_numbers<[1], [0], [0], [1], [0, 0, 1, 1], [], []>} : vector<2x4xf32>, vector<4x64xf32>, vector<2x64xf32> -> vector<2x64xf32>
    %10 = arith.negf %9 : vector<2x64xf32>
    %11 = math.exp %10 : vector<2x64xf32>
    %cst_10 = arith.constant 1.000000e+00 : f32
    %12 = vector.broadcast %cst_10 : f32 to vector<2x64xf32>
    %13 = arith.addf %12, %11 : vector<2x64xf32>
    %14 = arith.divf %12, %13 : vector<2x64xf32>
    %15 = vector.shape_cast %14 : vector<2x64xf32> to vector<2x64x1xf32>
    %c0_11 = arith.constant 0 : index
    %c0_12 = arith.constant 0 : index
    %c0_13 = arith.constant 0 : index
    %16 = vector.load %arg1[%c0_11, %c0_12, %c0_13] : memref<2x64x256xf32, #tpu.memory_space<vmem>>, vector<2x64x256xf32>
    %17 = vector.broadcast %15 : vector<2x64x1xf32> to vector<2x64x256xf32>
    %18 = arith.mulf %16, %17 : vector<2x64x256xf32>
    %c0_14 = arith.constant 0 : index
    %c0_15 = arith.constant 0 : index
    %c0_16 = arith.constant 0 : index
    %19 = vector.load %arg4[%c0_14, %c0_15, %c0_16] : memref<2x64x256xf32, #tpu.memory_space<vmem>>, vector<2x64x256xf32>
    tpu.vector_store %arg4[%c0_14, %c0_15, %c0_16], %18 {strides = array<i32>} : memref<2x64x256xf32, #tpu.memory_space<vmem>>, vector<2x64x256xf32>,
    return
  }
  func.func @transform_0(%arg0: i32) -> (i32, i32, i32) {
    %c0_i32 = arith.constant 0 : i32
    %c0_i32_0 = arith.constant 0 : i32
    %c0_i32_1 = arith.constant 0 : i32
    return %arg0, %c0_i32, %c0_i32_0 : i32, i32, i32
  }
  func.func @transform_1(%arg0: i32) -> (i32, i32) {
    %c0_i32 = arith.constant 0 : i32
    %c0_i32_0 = arith.constant 0 : i32
    %c0_i32_1 = arith.constant 0 : i32
    return %c0_i32, %c0_i32_0 : i32, i32
  }
  func.func @transform_2(%arg0: i32) -> (i32, i32) {
    %c0_i32 = arith.constant 0 : i32
    %c0_i32_0 = arith.constant 0 : i32
    %c0_i32_1 = arith.constant 0 : i32
    return %c0_i32, %c0_i32_0 : i32, i32
  }
  func.func @transform_3(%arg0: i32) -> (i32, i32, i32) {
    %c0_i32 = arith.constant 0 : i32
    %c0_i32_0 = arith.constant 0 : i32
    %c0_i32_1 = arith.constant 0 : i32
    return %arg0, %c0_i32, %c0_i32_0 : i32, i32, i32
  }
}

</mosaic_0001>

<bundles_post_ra>
// kernel: se_layer.1
= control target key start
LH: loop header
LB: loop body
LE: loop exit
PB: predicated region body
PF: predicated region fallthrough
CT: control target
= control target key end

     0   :  { %v586_v51 = vmov 0.0|0.0   ;;  %vm587_vm0 = vmmov 0   ;;  %v588_v61 = vmov 0.0   ;;  %vm146_vm1 = vcmask 130112   ;;  %s980_s0 = inlined_call_operand.vmem [shape: f32[2,64,256], index: 0, kind: input, shape index: {}]   ;;  %s981_s1 = inlined_call_operand.vmem [shape: f32[64,4], index: 1, kind: input, shape index: {}]   ;;  %s982_s2 = inlined_call_operand.vmem [shape: f32[4,64], index: 2, kind: input, shape index: {}]   ;;  %s983_s3 = inlined_call_operand.vmem [shape: f32[2,64,256], index: 3, kind: output, shape index: {}]  }
   0x1   :  { %v612_v0 = vld [vmem:[%s980_s0 + $0x80] sm:$0xff]  ;;  %v617_v1 = vld [vmem:[%s980_s0 + $0x88] sm:$0xff]  ;;  %v634_v5 = vld [vmem:[%s980_s0 + $0x90] sm:$0xff]  ;;  %567 = vmatprep.subr.bf16.mxu0 %v586_v51  ;;  %559 = vmatprep.mubr.msk.f32.mxu0 %vm587_vm0, %v588_v61  ;;  %vm153_vm2 = vcmask 195712   ;;  %vm160_vm3 = vcmask 261312   ;;  %vm167_vm4 = vcmask 326912  }
   0x2   :  { %v622_v2 = vld [vmem:[%s980_s0] sm:$0xff]  ;;  %v70_v3 = vadd.f32 %v617_v1, %v612_v0  ;;  %v629_v4 = vld [vmem:[%s980_s0 + $0x8] sm:$0xff]  ;;  %v639_v6 = vld [vmem:[%s980_s0 + $0x98] sm:$0xff]  ;;  %562 = vmatprep.subr.mxu1 %v588_v61  ;;  %564 = vmatprep.mubr.msk.f32.mxu1 %vm587_vm0, %v588_v61  ;;  %vm174_vm5 = vcmask 392512   ;;  %vm181_vm6 = vcmask 458112   ;;  %vm188_vm7 = vcmask 523712  }
   0x3   :  { %v46_v7 = vadd.f32 %v629_v4, %v622_v2  ;;  %v646_v8 = vld [vmem:[%s980_s0 + $0x10] sm:$0xff]  ;;  %v651_v9 = vld [vmem:[%s980_s0 + $0x18] sm:$0xff]  ;;  %v73_v10 = vadd.f32 %v639_v6, %v634_v5  ;;  %v660_v12 = vld [vmem:[%s980_s0 + $0xa0] sm:$0xff]  ;;  %vm229_vm8 = vcmask 1041409   ;;  %vm231_vm9 = vcmask 523264  }
   0x4   :  { %71 = vadd.xlane.f32.xlu1 %v70_v3  ;;  %v49_v11 = vadd.f32 %v651_v9, %v646_v8  ;;  %v665_v13 = vld [vmem:[%s980_s0 + $0xa8] sm:$0xff]  ;;  %v670_v14 = vld [vmem:[%s980_s0 + $0x20] sm:$0xff]  ;;  %v684_v18 = vld [vmem:[%s980_s0 + $0xb0] sm:$0xff]  ;;  %vm310_vm10 = vcmask 1043456   ;;  %vm306_vm11 = vcmask 31744  }
   0x5   :  { %47 = vadd.xlane.f32.xlu0 %v46_v7  ;;  %v675_v15 = vld [vmem:[%s980_s0 + $0x28] sm:$0xff]  ;;  %v76_v16 = vadd.f32 %v665_v13, %v660_v12  ;;  %v689_v19 = vld [vmem:[%s980_s0 + $0xb8] sm:$0xff]  ;;  %v694_v20 = vld [vmem:[%s980_s0 + $0x30] sm:$0xff] }
   0x6   :  { %v52_v17 = vadd.f32 %v675_v15, %v670_v14  ;;  %991 = vst [vmem:[#allocation2_spill] sm:$0xff] %v689_v19  ;;  %v699_v21 = vld [vmem:[%s980_s0 + $0x38] sm:$0xff]  ;;  %v79_v22 = vadd.f32 %v689_v19, %v684_v18  ;;  %v708_v24 = vld [vmem:[%s980_s0 + $0xc0] sm:$0xff]  ;;  %v713_v25 = vld [vmem:[%s980_s0 + $0xc8] sm:$0xff] }
   0x7   :  { %v55_v23 = vadd.f32 %v699_v21, %v694_v20  ;;  %v718_v26 = vld [vmem:[%s980_s0 + $0x40] sm:$0xff]  ;;  %v723_v27 = vld [vmem:[%s980_s0 + $0x48] sm:$0xff]  ;;  %v82_v28 = vadd.f32 %v713_v25, %v708_v24  ;;  %v732_v30 = vld [vmem:[%s980_s0 + $0xd0] sm:$0xff] }
   0x8   :  { %74 = vadd.xlane.f32.xlu1 %v73_v10  ;;  %v58_v29 = vadd.f32 %v723_v27, %v718_v26  ;;  %992 = vst [vmem:[#allocation3_spill] sm:$0xff] %v732_v30  ;;  %v737_v31 = vld [vmem:[%s980_s0 + $0xd8] sm:$0xff]  ;;  %v742_v32 = vld [vmem:[%s980_s0 + $0x50] sm:$0xff]  ;;  %v756_v36 = vld [vmem:[%s980_s0 + $0xe0] sm:$0xff]  ;;  %v135_v10 = vlaneseq }
   0x9   :  { %50 = vadd.xlane.f32.xlu0 %v49_v11  ;;  %993 = vst [vmem:[#allocation4_spill] sm:$0xff] %v737_v31  ;;  %v747_v33 = vld [vmem:[%s980_s0 + $0x58] sm:$0xff]  ;;  %v85_v34 = vadd.f32 %v737_v31, %v732_v30  ;;  %994 = vst [vmem:[#allocation5_spill] sm:$0xff] %v756_v36  ;;  %v761_v37 = vld [vmem:[%s980_s0 + $0xe8] sm:$0xff] }
   0xa   :  { %v61_v35 = vadd.f32 %v747_v33, %v742_v32  ;;  %995 = vst [vmem:[#allocation6_spill] sm:$0xff] %v761_v37  ;;  %v766_v38 = vld [vmem:[%s980_s0 + $0x60] sm:$0xff]  ;;  %v771_v39 = vld [vmem:[%s980_s0 + $0x68] sm:$0xff]  ;;  %v88_v40 = vadd.f32 %v761_v37, %v756_v36  ;;  %v780_v42 = vld [vmem:[%s980_s0 + $0xf0] sm:$0xff] }
   0xb   :  { %v64_v41 = vadd.f32 %v771_v39, %v766_v38  ;;  %996 = vst [vmem:[#allocation7_spill] sm:$0xff] %v780_v42  ;;  %v785_v43 = vld [vmem:[%s980_s0 + $0xf8] sm:$0xff]  ;;  %v790_v44 = vld [vmem:[%s980_s0 + $0x70] sm:$0xff]  ;;  %v111_v48 = vld [vmem:[%s981_s1] sm:$0xff] }
   0xc   :  { %77 = vadd.xlane.f32.xlu1 %v76_v16  ;;  %997 = vst [vmem:[#allocation8_spill] sm:$0xff] %v785_v43  ;;  %v795_v45 = vld [vmem:[%s980_s0 + $0x78] sm:$0xff]  ;;  %v91_v46 = vadd.f32 %v785_v43, %v780_v42  ;;  %v112_v49 = vld [vmem:[%s981_s1 + $0x8] sm:$0xff]  ;;  %v113_v52 = vld [vmem:[%s981_s1 + $0x10] sm:$0xff] }
   0xd   :  { %53 = vadd.xlane.f32.xlu0 %v52_v17  ;;  %v67_v47 = vadd.f32 %v795_v45, %v790_v44  ;;  %v568_v50 = vpack.c.bf16 %v112_v49, %v111_v48  ;;  %v114_v53 = vld [vmem:[%s981_s1 + $0x18] sm:$0xff]  ;;  %v115_v55 = vld [vmem:[%s981_s1 + $0x20] sm:$0xff]  ;;  %v116_v56 = vld [vmem:[%s981_s1 + $0x28] sm:$0xff]  ;;  %v136_v17 = vand.u32 127, %v135_v10 }
   0xe   :  { %v571_v54 = vpack.c.bf16 %v114_v53, %v113_v52  ;;  %v574_v57 = vpack.c.bf16 %v116_v56, %v115_v55  ;;  %v117_v58 = vld [vmem:[%s981_s1 + $0x30] sm:$0xff]  ;;  %v118_v59 = vld [vmem:[%s981_s1 + $0x38] sm:$0xff] }
   0xf   :  { %569 = vmatpush3.bf16.msra.mxu0 %v568_v50  ;;  %v577_v60 = vpack.c.bf16 %v118_v59, %v117_v58 }
  0x10   :  { %80 = vadd.xlane.f32.xlu1 %v79_v22  ;;  %570 = vmatprep.subr.bf16.mxu0 %v586_v51 }
  0x11   :  { %56 = vadd.xlane.f32.xlu0 %v55_v23  ;;  %v825_v23 = vshrl.u32 %v135_v10, 7 }
  0x13   :  { %572 = vmatpush3.bf16.msra.mxu0 %v571_v54 }
  0x14   :  { %83 = vadd.xlane.f32.xlu1 %v82_v28  ;;  %573 = vmatprep.subr.bf16.mxu0 %v586_v51 }
  0x15   :  { %59 = vadd.xlane.f32.xlu0 %v58_v29  ;;  %v141_v29 = vadd.s32 4294967288, %v136_v17 }
  0x17   :  { %575 = vmatpush3.bf16.msra.mxu0 %v574_v57  ;;  %v144_v49 = vsub.s32 %v141_v29, %v825_v23 }
  0x18   :  { %86 = vadd.xlane.f32.xlu1 %v85_v34  ;;  %576 = vmatprep.subr.bf16.mxu0 %v586_v51  ;;  %v148_v34 = vadd.s32 4294967280, %v136_v17  ;;  %v176_v51 = vadd.s32 4294967248, %v136_v17 }
  0x19   :  { %62 = vadd.xlane.f32.xlu0 %v61_v35  ;;  %v155_v35 = vadd.s32 4294967272, %v136_v17 }
  0x1a   :  { %v151_v50 = vsub.s32 %v148_v34, %v825_v23 }
  0x1b   :  { %578 = vmatpush3.bf16.msra.mxu0 %v577_v60  ;;  %v158_v53 = vsub.s32 %v155_v35, %v825_v23 }
  0x1c   :  { %89 = vadd.xlane.f32.xlu1 %v88_v40  ;;  %v162_v40 = vadd.s32 4294967264, %v136_v17 }
  0x1d   :  { %65 = vadd.xlane.f32.xlu0 %v64_v41 }
  0x1e   :  { %v165_v54 = vsub.s32 %v162_v40, %v825_v23  ;;  %v183_v40 = vadd.s32 4294967240, %v136_v17 }
  0x20   :  { %92 = vadd.xlane.f32.xlu1 %v91_v46  ;;  %v169_v46 = vadd.s32 4294967256, %v136_v17 }
  0x21   :  { %68 = vadd.xlane.f32.xlu0 %v67_v47  ;;  %v139_v47 = vsub.s32 %v136_v17, %v825_v23  ;;  %v186_v17 = vsub.s32 %v183_v40, %v825_v23 }
  0x22   :  { %v172_v57 = vsub.s32 %v169_v46, %v825_v23 }
  0x91   :  { %v72_v62 = vpop.xlane.xlu1 %71 }
  0x92   :  { %v48_v63 = vpop.xlane.xlu0 %47  ;;  %v103_v59 = vmul.f32 0.00390625, %v72_v62 }
  0x93   :  { %v95_v29 = vmul.f32 0.00390625, %v48_v63 }
  0x94   :  { %v193_v37 = vrot.slane %v103_v59, %v139_v47 }
  0x95   :  { %v75_v3 = vpop.xlane.xlu1 %74  ;;  %v140_v19 = vrot.slane %v95_v29, %v139_v47 }
  0x96   :  { %v51_v7 = vpop.xlane.xlu0 %50  ;;  %v104_v52 = vmul.f32 0.00390625, %v75_v3  ;;  %v179_v3 = vsub.s32 %v176_v51, %v825_v23 }
  0x97   :  { %v96_v55 = vmul.f32 0.00390625, %v51_v7 }
  0x98   :  { %v197_v35 = vrot.slane %v104_v52, %v144_v49 }
  0x99   :  { %v78_v11 = vpop.xlane.xlu1 %77  ;;  %v145_v7 = vrot.slane %v96_v55, %v144_v49 }
  0x9a   :  { %v54_v16 = vpop.xlane.xlu0 %53  ;;  %v105_v56 = vmul.f32 0.00390625, %v78_v11  ;;  %v198_v51 = vsel %vm146_vm1, %v197_v35, %v193_v37  ;;  %v305_v35 = vld [vmem:[%s982_s2] sm:$0xf] }
  0x9b   :  { %v97_v60 = vmul.f32 0.00390625, %v54_v16  ;;  %v147_v49 = vsel %vm146_vm1, %v145_v7, %v140_v19  ;;  %563 = vmatpush3.msk.msra.mxu1 %vm310_vm10, %v305_v35 }
  0x9c   :  { %v202_v11 = vrot.slane %v105_v56, %v151_v50 }
  0x9d   :  { %v81_v22 = vpop.xlane.xlu1 %80  ;;  %v152_v62 = vrot.slane %v97_v60, %v151_v50 }
  0x9e   :  { %v57_v28 = vpop.xlane.xlu0 %56  ;;  %v106_v61 = vmul.f32 0.00390625, %v81_v22  ;;  %v203_v55 = vsel %vm153_vm2, %v202_v11, %v198_v51 }
  0x9f   :  { %v98_v34 = vmul.f32 0.00390625, %v57_v28  ;;  %v154_v59 = vsel %vm153_vm2, %v152_v62, %v147_v49 }
  0xa0   :  { %v207_v16 = vrot.slane %v106_v61, %v158_v53 }
  0xa1   :  { %v84_v41 = vpop.xlane.xlu1 %83  ;;  %v159_v63 = vrot.slane %v98_v34, %v158_v53 }
  0xa2   :  { %v60_v48 = vpop.xlane.xlu0 %59  ;;  %v107_v43 = vmul.f32 0.00390625, %v84_v41  ;;  %v208_v47 = vsel %vm160_vm3, %v207_v16, %v203_v55 }
  0xa3   :  { %v99_v42 = vmul.f32 0.00390625, %v60_v48  ;;  %v161_v37 = vsel %vm160_vm3, %v159_v63, %v154_v59 }
  0xa4   :  { %v212_v28 = vrot.slane %v107_v43, %v165_v54 }
  0xa5   :  { %v87_v58 = vpop.xlane.xlu1 %86  ;;  %v166_v52 = vrot.slane %v99_v42, %v165_v54 }
  0xa6   :  { %v63_v10 = vpop.xlane.xlu0 %62  ;;  %v108_v31 = vmul.f32 0.00390625, %v87_v58 }
  0xa7   :  { %v100_v30 = vmul.f32 0.00390625, %v63_v10  ;;  %v168_v19 = vsel %vm167_vm4, %v166_v52, %v161_v37  ;;  %v427_v52 = vsub.s32 1, %v825_v23 }
  0xa8   :  { %v217_v48 = vrot.slane %v108_v31, %v172_v57  ;;  %v213_v31 = vsel %vm167_vm4, %v212_v28, %v208_v47  ;;  %v392_v28 = vsub.s32 0, %v825_v23 }
  0xa9   :  { %v90_v46 = vpop.xlane.xlu1 %89  ;;  %v173_v56 = vrot.slane %v100_v30, %v172_v57 }
  0xaa   :  { %v109_v22 = vmul.f32 0.00390625, %v90_v46  ;;  %v66_v36 = vpop.xlane.xlu0 %65  ;;  %v218_v54 = vsel %vm174_vm5, %v217_v48, %v213_v31 }
  0xab   :  { %v101_v41 = vmul.f32 0.00390625, %v66_v36  ;;  %v175_v57 = vsel %vm174_vm5, %v173_v56, %v168_v19 }
  0xac   :  { %v222_v58 = vrot.slane %v109_v22, %v179_v3 }
  0xad   :  { %v93_v50 = vpop.xlane.xlu1 %92  ;;  %v180_v53 = vrot.slane %v101_v41, %v179_v3 }
  0xae   :  { %v110_v43 = vmul.f32 0.00390625, %v93_v50  ;;  %v69_v36 = vpop.xlane.xlu0 %68  ;;  %v223_v60 = vsel %vm181_vm6, %v222_v58, %v218_v54 }
  0xaf   :  { %v102_v42 = vmul.f32 0.00390625, %v69_v36  ;;  %v182_v10 = vsel %vm181_vm6, %v180_v53, %v175_v57 }
  0xb0   :  { %v227_v30 = vrot.slane %v110_v43, %v186_v17 }
  0xb1   :  { %v187_v61 = vrot.slane %v102_v42, %v186_v17 }
  0xb2   :  { %v228_v29 = vsel %vm188_vm7, %v227_v30, %v223_v60  ;;  %v999_v30 = vld [vmem:[#allocation5_spill] sm:$0xff]  ;;  %v1000_v60 = vld [vmem:[#allocation6_spill] sm:$0xff] }
  0xb3   :  { %v189_v34 = vsel %vm188_vm7, %v187_v61, %v182_v10  ;;  %v1001_v10 = vld [vmem:[#allocation3_spill] sm:$0xff] }
  0xb4   :  { %v230_v3 = vsel %vm229_vm8, %v228_v29, %v189_v34  ;;  %v1002_v34 = vld [vmem:[#allocation4_spill] sm:$0xff] }
  0xb5   :  { %560 = vmatmul.mubr.msk.f32.vlgmr.msra.gmra.mrb[0].mxu0 %vm231_vm9, %v230_v3 }
 0x188   :  { %v300_v40 = vpop.f32.mrb[0].mxu0 }
 0x189   :  { %v304_v7 = vmax.f32 %v300_v40, 0.0  ;;  %v561_v11 = vpop.f32.mrb[1].mxu0  ;;  %v1003_v40 = vld [vmem:[#allocation7_spill] sm:$0xff] }
 0x18a   :  { %v1004_v11 = vld [vmem:[#allocation8_spill] sm:$0xff] }
 0x18b   :  { %565 = vmatmul.mubr.msk.f32.vlgmr.msra.gmra.mrb[0].mxu1 %vm306_vm11, %v304_v7 }
 0x25e   :  { %v380_v46 = vpop.f32.mrb[0].mxu1 }
 0x25f   :  { %v531_v62 = vmul.f32 -1.442695, %v380_v46  ;;  %v566_v16 = vpop.f32.mrb[1].mxu1 }
 0x261   :  { %582 = vpow2.f32 %v531_v62 }
 0x26b   :  { %v583_v22 = vpop.eup %582 }
 0x26c   :  { %v387_v63 = vadd.f32 1.0, %v583_v22 }
 0x26e   :  { %584 = vrcp.f32 %v387_v63 }
 0x278   :  { %v585_v41 = vpop.eup %584 }
 0x279   :  { %v393_v51 = vrot.slane %v585_v41, %v392_v28  ;;  %v428_v48 = vrot.slane %v585_v41, %v427_v52 }
 0x27b   :  { %399 = vbcast.lane.b32.xlu1 %v393_v51, 264  ;;  %395 = vbcast.lane.b32.xlu0 %v393_v51, 256 }
 0x27f   :  { %403 = vbcast.lane.b32.xlu1 %v393_v51, 272  ;;  %411 = vbcast.lane.b32.xlu0 %v393_v51, 288 }
 0x283   :  { %407 = vbcast.lane.b32.xlu1 %v393_v51, 280  ;;  %419 = vbcast.lane.b32.xlu0 %v393_v51, 304 }
 0x287   :  { %415 = vbcast.lane.b32.xlu1 %v393_v51, 296  ;;  %430 = vbcast.lane.b32.xlu0 %v428_v48, 256 }
 0x28b   :  { %423 = vbcast.lane.b32.xlu1 %v393_v51, 312  ;;  %438 = vbcast.lane.b32.xlu0 %v428_v48, 272 }
 0x28f   :  { %434 = vbcast.lane.b32.xlu1 %v428_v48, 264  ;;  %446 = vbcast.lane.b32.xlu0 %v428_v48, 288 }
 0x293   :  { %442 = vbcast.lane.b32.xlu1 %v428_v48, 280  ;;  %454 = vbcast.lane.b32.xlu0 %v428_v48, 304 }
 0x297   :  { %450 = vbcast.lane.b32.xlu1 %v428_v48, 296 }
 0x29b   :  { %458 = vbcast.lane.b32.xlu1 %v428_v48, 312 }
 0x2ed   :  { %v400_v17 = vpop.permute.xlu1 %399  ;;  %v396_v49 = vpop.permute.xlu0 %395 }
 0x2ee   :  { %v462_v55 = vmul.f32 %v400_v17, %v646_v8  ;;  %v463_v56 = vmul.f32 %v400_v17, %v651_v9  ;;  %v460_v23 = vmul.f32 %v396_v49, %v622_v2  ;;  %v461_v58 = vmul.f32 %v396_v49, %v629_v4 }
 0x2f0   :  { %494 = vst [vmem:[%s983_s3 + $0x10] sm:$0xff] %v462_v55  ;;  %495 = vst [vmem:[%s983_s3 + $0x18] sm:$0xff] %v463_v56 }
 0x2f1   :  { %492 = vst [vmem:[%s983_s3] sm:$0xff] %v460_v23  ;;  %493 = vst [vmem:[%s983_s3 + $0x8] sm:$0xff] %v461_v58  ;;  %v404_v8 = vpop.permute.xlu1 %403  ;;  %v412_v2 = vpop.permute.xlu0 %411 }
 0x2f2   :  { %v464_v4 = vmul.f32 %v404_v8, %v670_v14  ;;  %v465_v9 = vmul.f32 %v404_v8, %v675_v15  ;;  %v468_v50 = vmul.f32 %v412_v2, %v718_v26  ;;  %v469_v59 = vmul.f32 %v412_v2, %v723_v27 }
 0x2f4   :  { %496 = vst [vmem:[%s983_s3 + $0x20] sm:$0xff] %v464_v4  ;;  %497 = vst [vmem:[%s983_s3 + $0x28] sm:$0xff] %v465_v9 }
 0x2f5   :  { %500 = vst [vmem:[%s983_s3 + $0x40] sm:$0xff] %v468_v50  ;;  %501 = vst [vmem:[%s983_s3 + $0x48] sm:$0xff] %v469_v59  ;;  %v408_v14 = vpop.permute.xlu1 %407  ;;  %v420_v15 = vpop.permute.xlu0 %419 }
 0x2f6   :  { %v466_v26 = vmul.f32 %v408_v14, %v694_v20  ;;  %v467_v27 = vmul.f32 %v408_v14, %v699_v21  ;;  %v472_v47 = vmul.f32 %v420_v15, %v766_v38  ;;  %v473_v53 = vmul.f32 %v420_v15, %v771_v39 }
 0x2f8   :  { %498 = vst [vmem:[%s983_s3 + $0x30] sm:$0xff] %v466_v26  ;;  %499 = vst [vmem:[%s983_s3 + $0x38] sm:$0xff] %v467_v27 }
 0x2f9   :  { %504 = vst [vmem:[%s983_s3 + $0x60] sm:$0xff] %v472_v47  ;;  %505 = vst [vmem:[%s983_s3 + $0x68] sm:$0xff] %v473_v53  ;;  %v416_v20 = vpop.permute.xlu1 %415  ;;  %v431_v21 = vpop.permute.xlu0 %430 }
 0x2fa   :  { %v470_v38 = vmul.f32 %v416_v20, %v742_v32  ;;  %v471_v39 = vmul.f32 %v416_v20, %v747_v33  ;;  %v476_v43 = vmul.f32 %v431_v21, %v612_v0  ;;  %v477_v36 = vmul.f32 %v431_v21, %v617_v1 }
 0x2fc   :  { %502 = vst [vmem:[%s983_s3 + $0x50] sm:$0xff] %v470_v38  ;;  %503 = vst [vmem:[%s983_s3 + $0x58] sm:$0xff] %v471_v39 }
 0x2fd   :  { %508 = vst [vmem:[%s983_s3 + $0x80] sm:$0xff] %v476_v43  ;;  %509 = vst [vmem:[%s983_s3 + $0x88] sm:$0xff] %v477_v36  ;;  %v424_v32 = vpop.permute.xlu1 %423  ;;  %v439_v0 = vpop.permute.xlu0 %438 }
 0x2fe   :  { %v474_v1 = vmul.f32 %v424_v32, %v790_v44  ;;  %v475_v33 = vmul.f32 %v424_v32, %v795_v45  ;;  %v480_v37 = vmul.f32 %v439_v0, %v660_v12  ;;  %v481_v31 = vmul.f32 %v439_v0, %v665_v13 }
 0x300   :  { %506 = vst [vmem:[%s983_s3 + $0x70] sm:$0xff] %v474_v1  ;;  %507 = vst [vmem:[%s983_s3 + $0x78] sm:$0xff] %v475_v33 }
 0x301   :  { %512 = vst [vmem:[%s983_s3 + $0xa0] sm:$0xff] %v480_v37  ;;  %513 = vst [vmem:[%s983_s3 + $0xa8] sm:$0xff] %v481_v31  ;;  %v435_v44 = vpop.permute.xlu1 %434  ;;  %v447_v12 = vpop.permute.xlu0 %446 }
 0x302   :  { %v478_v13 = vmul.f32 %v435_v44, %v634_v5  ;;  %v479_v45 = vmul.f32 %v435_v44, %v639_v6  ;;  %v484_v42 = vmul.f32 %v447_v12, %v708_v24  ;;  %v485_v19 = vmul.f32 %v447_v12, %v713_v25  ;;  %v998_v25 = vld [vmem:[#allocation2_spill] sm:$0xff] }
 0x304   :  { %510 = vst [vmem:[%s983_s3 + $0x90] sm:$0xff] %v478_v13  ;;  %511 = vst [vmem:[%s983_s3 + $0x98] sm:$0xff] %v479_v45 }
 0x305   :  { %516 = vst [vmem:[%s983_s3 + $0xc0] sm:$0xff] %v484_v42  ;;  %517 = vst [vmem:[%s983_s3 + $0xc8] sm:$0xff] %v485_v19  ;;  %v443_v5 = vpop.permute.xlu1 %442  ;;  %v455_v6 = vpop.permute.xlu0 %454 }
 0x306   :  { %v482_v24 = vmul.f32 %v443_v5, %v684_v18  ;;  %v483_v54 = vmul.f32 %v443_v5, %v998_v25  ;;  %v488_v57 = vmul.f32 %v455_v6, %v999_v30  ;;  %v489_v61 = vmul.f32 %v455_v6, %v1000_v60 }
 0x308   :  { %514 = vst [vmem:[%s983_s3 + $0xb0] sm:$0xff] %v482_v24  ;;  %515 = vst [vmem:[%s983_s3 + $0xb8] sm:$0xff] %v483_v54 }
 0x309   :  { %520 = vst [vmem:[%s983_s3 + $0xe0] sm:$0xff] %v488_v57  ;;  %521 = vst [vmem:[%s983_s3 + $0xe8] sm:$0xff] %v489_v61  ;;  %v451_v18 = vpop.permute.xlu1 %450 }
 0x30a   :  { %v486_v29 = vmul.f32 %v451_v18, %v1001_v10  ;;  %v487_v3 = vmul.f32 %v451_v18, %v1002_v34 }
 0x30c   :  { %518 = vst [vmem:[%s983_s3 + $0xd0] sm:$0xff] %v486_v29  ;;  %519 = vst [vmem:[%s983_s3 + $0xd8] sm:$0xff] %v487_v3 }
 0x30d   :  { %v459_v35 = vpop.permute.xlu1 %458 }
 0x30e   :  { %v490_v7 = vmul.f32 %v459_v35, %v1003_v40  ;;  %v491_v46 = vmul.f32 %v459_v35, %v1004_v11 }
 0x310   :  { %522 = vst [vmem:[%s983_s3 + $0xf0] sm:$0xff] %v490_v7  ;;  %523 = vst [vmem:[%s983_s3 + $0xf8] sm:$0xff] %v491_v46 }

</bundles_post_ra>
